<compile_context>
chip_gen: v7x
topology: tpu7x:2x2x1
jax: 0.10.0
libtpu: 0.0.40
codegen_flags: <defaults>
</compile_context>

<pallas_src>
import functools
import math

import jax
import jax.numpy as jnp
from jax import lax
from jax.experimental import pallas as pl
from jax.experimental.pallas import tpu as pltpu


def _round_up(n, m):
    return ((n + m - 1) // m) * m


def _policy_fwd_kernel(x_ref, wfc_ref, bfc_ref, wh_ref, bh_ref, o_ref, *, action_dims):
    """Fused forward: h = relu(x @ Wfc + bfc); logits = h @ Wheads + bheads;
    per-head (segmented) numerically-stable softmax over the padded 128 columns."""
    # fc + ReLU : bf16 operands on the MXU (short K contraction padded in-register),
    # f32 accumulate + f32 epilogue (v5e-safe).
    h = jnp.dot(x_ref[...], wfc_ref[...], preferred_element_type=jnp.float32)
    h = jnp.maximum(h + bfc_ref[...], 0.0)

    # All heads in one lane-dense matmul: (TB, 128) @ (128, P) -> f32 logits.
    logits = jnp.dot(h.astype(jnp.bfloat16), wh_ref[...],
                     preferred_element_type=jnp.float32)
    logits = logits + bh_ref[...]

    # ---- Segmented softmax with a SINGLE exp over the whole (TB, P) tile ----
    total = sum(action_dims)
    col = lax.broadcasted_iota(jnp.int32, logits.shape, 1)

    # Per-column row-max map: m[b, c] = max over the segment that owns column c.
    m = jnp.zeros_like(logits)
    off = 0
    for dim in action_dims:  # static unroll over heads
        in_seg = (col >= off) & (col < off + dim)
        seg_max = jnp.max(jnp.where(in_seg, logits, -jnp.inf), axis=-1, keepdims=True)
        m = jnp.where(in_seg, seg_max, m)
        off += dim

    # One exp; zero-padded columns are shifted to -inf so they contribute exactly 0.
    shifted = jnp.where(col < total, logits - m, -jnp.inf)
    e = jnp.exp(shifted)  # the only transcendental in the epilogue (1-slot EUP)

    # Per-column denominator map; padded columns keep 1.0 (output 0 there, no NaN).
    # NOTE: with many heads the reductions could instead be one matmul e @ S
    # (S a static 0/1 block-diagonal matrix) to move them to the mostly-idle MXU.
    d = jnp.ones_like(logits)
    off = 0
    for dim in action_dims:
        in_seg = (col >= off) & (col < off + dim)
        seg_sum = jnp.sum(jnp.where(in_seg, e, 0.0), axis=-1, keepdims=True)
        d = jnp.where(in_seg, seg_sum, d)
        off += dim

    out = e * pl.reciprocal(d, approx=True)  # EUP vrcp
    o_ref[...] = out.astype(o_ref.dtype)     # lane-dense (TB, 128) bf16 store


@functools.partial(jax.jit, static_argnames=("action_dims",))
def policy_forward(x, fc_w, fc_b, head_w, head_b, *, action_dims):
    B, K = x.shape
    _, H = fc_w.shape
    P = head_w.shape[1]

    # Batch tiling: large tiles amortize per-grid-step overhead (~0.35 us) and give
    # long unmasked 128-lane store runs; for B > cap keep >=2 grid steps so the
    # "parallel" axis shards across v7x's two TensorCores.
    cap = 1024
    if B <= cap:
        TB = _round_up(B, 16)
    else:
        TB = min(_round_up(pl.cdiv(B, 2), 16), cap)
    B_pad = _round_up(B, TB)

    xb = x.astype(jnp.bfloat16)
    if B_pad != B:
        xb = jnp.pad(xb, ((0, B_pad - B), (0, 0)))

    kernel = functools.partial(_policy_fwd_kernel, action_dims=action_dims)
    out = pl.pallas_call(
        kernel,
        out_shape=jax.ShapeDtypeStruct((B_pad, P), jnp.bfloat16),
        grid_spec=pltpu.PrefetchScalarGridSpec(
            num_scalar_prefetch=0,
            grid=(B_pad // TB,),
            in_specs=[
                pl.BlockSpec((TB, K), lambda i: (i, 0)),   # x tile (no K padding)
                pl.BlockSpec((K, H), lambda i: (0, 0)),    # fc weight (resident)
                pl.BlockSpec((1, H), lambda i: (0, 0)),    # fc bias
                pl.BlockSpec((H, P), lambda i: (0, 0)),    # concatenated head weights
                pl.BlockSpec((1, P), lambda i: (0, 0)),    # concatenated head biases
            ],
            out_specs=pl.BlockSpec((TB, P), lambda i: (i, 0)),
        ),
        compiler_params=pltpu.CompilerParams(
            dimension_semantics=("parallel",)),
    )(xb, fc_w, fc_b, head_w, head_b)

    # Per-head slicing stays in the JAX wrapper; only the few real columns are read,
    # and they are cast back to f32 to mirror the PyTorch module's output dtype.
    outs = []
    off = 0
    for dim in action_dims:
        outs.append(out[:B, off:off + dim].astype(jnp.float32))
        off += dim
    return tuple(outs)


class PolicyNetworkPallas:
    """JAX/Pallas equivalent of the PyTorch PolicyNetwork (fc -> ReLU -> heads -> softmax).

    Linear weights are stored transposed vs PyTorch ((in, out)); all head weights are
    concatenated column-wise and zero-padded to a lane-dense (128, 128) matrix so the
    whole forward is one fused kernel. Matmul weights are bf16; biases stay f32."""

    HIDDEN = 128

    def __init__(self, input_dim, action_dims, key):
        self.input_dim = int(input_dim)
        self.action_dims = tuple(int(d) for d in action_dims)
        H = self.HIDDEN
        self.p_pad = _round_up(sum(self.action_dims), 128)

        n_heads = len(self.action_dims)
        keys = jax.random.split(key, 2 + 2 * n_heads)
        k_fcw, k_fcb = keys[0], keys[1]

        # PyTorch nn.Linear default init: uniform(-1/sqrt(fan_in), +1/sqrt(fan_in)).
        b_fc = 1.0 / math.sqrt(self.input_dim)
        fc_w = jax.random.uniform(k_fcw, (self.input_dim, H), jnp.float32, -b_fc, b_fc)
        fc_b = jax.random.uniform(k_fcb, (H,), jnp.float32, -b_fc, b_fc)
        self.fc_w = fc_w.astype(jnp.bfloat16)            # (K, 128), un-padded K
        self.fc_b = fc_b.reshape(1, H).astype(jnp.float32)

        # Concatenate all heads column-wise into one (H, p_pad) weight (zero pad).
        b_h = 1.0 / math.sqrt(H)
        wh = jnp.zeros((H, self.p_pad), jnp.float32)
        bh = jnp.zeros((1, self.p_pad), jnp.float32)
        off = 0
        for i, dim in enumerate(self.action_dims):
            kw, kb = keys[2 + 2 * i], keys[3 + 2 * i]
            w = jax.random.uniform(kw, (H, dim), jnp.float32, -b_h, b_h)
            b = jax.random.uniform(kb, (dim,), jnp.float32, -b_h, b_h)
            wh = wh.at[:, off:off + dim].set(w)
            bh = bh.at[0, off:off + dim].set(b)
            off += dim
        self.head_w = wh.astype(jnp.bfloat16)
        self.head_b = bh  # f32

    def __call__(self, x):
        return list(policy_forward(x, self.fc_w, self.fc_b, self.head_w, self.head_b,
                                   action_dims=self.action_dims))


def reference_forward(net: PolicyNetworkPallas, x):
    """Pure-JAX reference mirroring the kernel's dtype choices (bf16 matmul operands,
    f32 accumulation/epilogue, bf16 output store) for a tight numerical comparison."""
    xr = x.astype(jnp.bfloat16).astype(jnp.float32)
    w1 = net.fc_w.astype(jnp.float32)
    h = jnp.maximum(xr @ w1 + net.fc_b, 0.0)
    hb = h.astype(jnp.bfloat16).astype(jnp.float32)
    logits = hb @ net.head_w.astype(jnp.float32) + net.head_b
    outs = []
    off = 0
    for dim in net.action_dims:
        p = jax.nn.softmax(logits[:, off:off + dim], axis=-1)
        outs.append(p.astype(jnp.bfloat16).astype(jnp.float32))  # mirror bf16 store
        off += dim
    return outs


if __name__ == "__main__":
    key = jax.random.PRNGKey(0)
    k_params, k_x = jax.random.split(key)

    batch = 8
    input_dim = 16
    action_dims = [4, 6]

    net = PolicyNetworkPallas(input_dim, action_dims, k_params)
    x = jax.random.normal(k_x, (batch, input_dim), jnp.float32)

    outs = net(x)
    outs = [jax.block_until_ready(o) for o in outs]

    # sanity: shapes, softmax rows sum to ~1 (bf16 store + approx reciprocal), and
    # match the pure-JAX reference that mirrors the kernel's dtype choices.
    assert [o.shape for o in outs] == [(batch, d) for d in action_dims]
    refs = reference_forward(net, x)
    for o, r in zip(outs, refs):
        assert jnp.allclose(jnp.sum(o, axis=-1), 1.0, atol=1e-2)
        assert jnp.allclose(o, r, atol=1e-2)

    print("KERNEL_OK")
</pallas_src>

<mosaic_0001>
module attributes {stable_mosaic.version = 11 : i64} {
  func.func @_policy_fwd_kernel(%arg0: i32, %arg1: memref<16x16xbf16, #tpu.memory_space<vmem>>, %arg2: memref<16x128xbf16, #tpu.memory_space<vmem>>, %arg3: memref<1x128xf32, #tpu.memory_space<vmem>>, %arg4: memref<128x128xbf16, #tpu.memory_space<vmem>>, %arg5: memref<1x128xf32, #tpu.memory_space<vmem>>, %arg6: memref<16x128xbf16, #tpu.memory_space<vmem>>) attributes {dimension_semantics = [#tpu.dimension_semantics<parallel>], iteration_bounds = array<i64: 1>, scalar_prefetch = 0 : i64, scratch_operands = 0 : i64, tpu.core_type = #tpu.core_type<tc>, window_params = [{transform_indices = @transform_0, window_bounds = array<i64: 16, 16>}, {pipeline_mode = #tpu.pipeline_mode<synchronous>, transform_indices = @transform_1, window_bounds = array<i64: 16, 128>}, {pipeline_mode = #tpu.pipeline_mode<synchronous>, transform_indices = @transform_2, window_bounds = array<i64: 1, 128>}, {pipeline_mode = #tpu.pipeline_mode<synchronous>, transform_indices = @transform_3, window_bounds = array<i64: 128, 128>}, {pipeline_mode = #tpu.pipeline_mode<synchronous>, transform_indices = @transform_4, window_bounds = array<i64: 1, 128>}, {transform_indices = @transform_5, window_bounds = array<i64: 16, 128>}]} {
    %c0 = arith.constant 0 : index
    %c0_0 = arith.constant 0 : index
    %0 = vector.load %arg1[%c0, %c0_0] : memref<16x16xbf16, #tpu.memory_space<vmem>>, vector<16x16xbf16>
    %c0_1 = arith.constant 0 : index
    %c0_2 = arith.constant 0 : index
    %1 = vector.load %arg2[%c0_1, %c0_2] : memref<16x128xbf16, #tpu.memory_space<vmem>>, vector<16x128xbf16>
    %cst = arith.constant dense<0.000000e+00> : vector<16x128xf32>
    %2 = tpu.matmul %0, %1, %cst {dimension_numbers = #tpu.dot_dimension_numbers<[1], [0], [0], [1], [0, 0, 1, 1], [], []>} : vector<16x16xbf16>, vector<16x128xbf16>, vector<16x128xf32> -> vector<16x128xf32>
    %c0_3 = arith.constant 0 : index
    %c0_4 = arith.constant 0 : index
    %3 = vector.load %arg3[%c0_3, %c0_4] : memref<1x128xf32, #tpu.memory_space<vmem>>, vector<1x128xf32>
    %4 = vector.broadcast %3 : vector<1x128xf32> to vector<16x128xf32>
    %5 = arith.addf %2, %4 : vector<16x128xf32>
    %cst_5 = arith.constant 0.000000e+00 : f32
    %6 = vector.broadcast %cst_5 : f32 to vector<16x128xf32>
    %7 = arith.maximumf %5, %6 : vector<16x128xf32>
    %8 = arith.truncf %7 : vector<16x128xf32> to vector<16x128xbf16>
    %c0_6 = arith.constant 0 : index
    %c0_7 = arith.constant 0 : index
    %9 = vector.load %arg4[%c0_6, %c0_7] : memref<128x128xbf16, #tpu.memory_space<vmem>>, vector<128x128xbf16>
    %cst_8 = arith.constant dense<0.000000e+00> : vector<16x128xf32>
    %10 = tpu.matmul %8, %9, %cst_8 {dimension_numbers = #tpu.dot_dimension_numbers<[1], [0], [0], [1], [0, 0, 1, 1], [], []>} : vector<16x128xbf16>, vector<128x128xbf16>, vector<16x128xf32> -> vector<16x128xf32>
    %c0_9 = arith.constant 0 : index
    %c0_10 = arith.constant 0 : index
    %11 = vector.load %arg5[%c0_9, %c0_10] : memref<1x128xf32, #tpu.memory_space<vmem>>, vector<1x128xf32>
    %12 = vector.broadcast %11 : vector<1x128xf32> to vector<16x128xf32>
    %13 = arith.addf %10, %12 : vector<16x128xf32>
    %14 = tpu.iota {dimensions = array<i32: 1>} : vector<16x128xi32>
    %cst_11 = arith.constant 0.000000e+00 : f32
    %15 = vector.broadcast %cst_11 : f32 to vector<16x128xf32>
    %c0_i32 = arith.constant 0 : i32
    %16 = vector.broadcast %c0_i32 : i32 to vector<16x128xi32>
    %17 = arith.cmpi sge, %14, %16 : vector<16x128xi32>
    %c4_i32 = arith.constant 4 : i32
    %18 = vector.broadcast %c4_i32 : i32 to vector<16x128xi32>
    %19 = arith.cmpi slt, %14, %18 : vector<16x128xi32>
    %20 = arith.andi %17, %19 : vector<16x128xi1>
    %cst_12 = arith.constant 0xFF800000 : f32
    %21 = vector.broadcast %cst_12 : f32 to vector<16x128xf32>
    %22 = arith.select %20, %13, %21 : vector<16x128xi1>, vector<16x128xf32>
    %cst_13 = arith.constant dense<0xFF800000> : vector<16xf32>
    %23 = vector.multi_reduction <maximumf>, %22, %cst_13 [1] : vector<16x128xf32> to vector<16xf32>
    %24 = vector.shape_cast %23 : vector<16xf32> to vector<16x1xf32>
    %25 = vector.shape_cast %24 : vector<16x1xf32> to vector<16x1xf32>
    %26 = vector.broadcast %25 : vector<16x1xf32> to vector<16x128xf32>
    %27 = arith.select %20, %26, %15 : vector<16x128xi1>, vector<16x128xf32>
    %c4_i32_14 = arith.constant 4 : i32
    %28 = vector.broadcast %c4_i32_14 : i32 to vector<16x128xi32>
    %29 = arith.cmpi sge, %14, %28 : vector<16x128xi32>
    %c10_i32 = arith.constant 10 : i32
    %30 = vector.broadcast %c10_i32 : i32 to vector<16x128xi32>
    %31 = arith.cmpi slt, %14, %30 : vector<16x128xi32>
    %32 = arith.andi %29, %31 : vector<16x128xi1>
    %cst_15 = arith.constant 0xFF800000 : f32
    %33 = vector.broadcast %cst_15 : f32 to vector<16x128xf32>
    %34 = arith.select %32, %13, %33 : vector<16x128xi1>, vector<16x128xf32>
    %cst_16 = arith.constant dense<0xFF800000> : vector<16xf32>
    %35 = vector.multi_reduction <maximumf>, %34, %cst_16 [1] : vector<16x128xf32> to vector<16xf32>
    %36 = vector.shape_cast %35 : vector<16xf32> to vector<16x1xf32>
    %37 = vector.shape_cast %36 : vector<16x1xf32> to vector<16x1xf32>
    %38 = vector.broadcast %37 : vector<16x1xf32> to vector<16x128xf32>
    %39 = arith.select %32, %38, %27 : vector<16x128xi1>, vector<16x128xf32>
    %c10_i32_17 = arith.constant 10 : i32
    %40 = vector.broadcast %c10_i32_17 : i32 to vector<16x128xi32>
    %41 = arith.cmpi slt, %14, %40 : vector<16x128xi32>
    %42 = arith.subf %13, %39 : vector<16x128xf32>
    %cst_18 = arith.constant 0xFF800000 : f32
    %43 = vector.broadcast %cst_18 : f32 to vector<16x128xf32>
    %44 = arith.select %41, %42, %43 : vector<16x128xi1>, vector<16x128xf32>
    %45 = math.exp %44 : vector<16x128xf32>
    %cst_19 = arith.constant 1.000000e+00 : f32
    %46 = vector.broadcast %cst_19 : f32 to vector<16x128xf32>
    %c0_i32_20 = arith.constant 0 : i32
    %47 = vector.broadcast %c0_i32_20 : i32 to vector<16x128xi32>
    %48 = arith.cmpi sge, %14, %47 : vector<16x128xi32>
    %c4_i32_21 = arith.constant 4 : i32
    %49 = vector.broadcast %c4_i32_21 : i32 to vector<16x128xi32>
    %50 = arith.cmpi slt, %14, %49 : vector<16x128xi32>
    %51 = arith.andi %48, %50 : vector<16x128xi1>
    %cst_22 = arith.constant 0.000000e+00 : f32
    %52 = vector.broadcast %cst_22 : f32 to vector<16x128xf32>
    %53 = arith.select %51, %45, %52 : vector<16x128xi1>, vector<16x128xf32>
    %cst_23 = arith.constant dense<0.000000e+00> : vector<16xf32>
    %54 = vector.multi_reduction <add>, %53, %cst_23 [1] : vector<16x128xf32> to vector<16xf32>
    %55 = vector.shape_cast %54 : vector<16xf32> to vector<16x1xf32>
    %56 = vector.shape_cast %55 : vector<16x1xf32> to vector<16x1xf32>
    %57 = vector.broadcast %56 : vector<16x1xf32> to vector<16x128xf32>
    %58 = arith.select %51, %57, %46 : vector<16x128xi1>, vector<16x128xf32>
    %c4_i32_24 = arith.constant 4 : i32
    %59 = vector.broadcast %c4_i32_24 : i32 to vector<16x128xi32>
    %60 = arith.cmpi sge, %14, %59 : vector<16x128xi32>
    %c10_i32_25 = arith.constant 10 : i32
    %61 = vector.broadcast %c10_i32_25 : i32 to vector<16x128xi32>
    %62 = arith.cmpi slt, %14, %61 : vector<16x128xi32>
    %63 = arith.andi %60, %62 : vector<16x128xi1>
    %cst_26 = arith.constant 0.000000e+00 : f32
    %64 = vector.broadcast %cst_26 : f32 to vector<16x128xf32>
    %65 = arith.select %63, %45, %64 : vector<16x128xi1>, vector<16x128xf32>
    %cst_27 = arith.constant dense<0.000000e+00> : vector<16xf32>
    %66 = vector.multi_reduction <add>, %65, %cst_27 [1] : vector<16x128xf32> to vector<16xf32>
    %67 = vector.shape_cast %66 : vector<16xf32> to vector<16x1xf32>
    %68 = vector.shape_cast %67 : vector<16x1xf32> to vector<16x1xf32>
    %69 = vector.broadcast %68 : vector<16x1xf32> to vector<16x128xf32>
    %70 = arith.select %63, %69, %58 : vector<16x128xi1>, vector<16x128xf32>
    %71 = tpu.reciprocal %70 {approx = true} : vector<16x128xf32> -> vector<16x128xf32>
    %72 = arith.mulf %45, %71 : vector<16x128xf32>
    %73 = arith.truncf %72 : vector<16x128xf32> to vector<16x128xbf16>
    %c0_28 = arith.constant 0 : index
    %c0_29 = arith.constant 0 : index
    %74 = vector.load %arg6[%c0_28, %c0_29] : memref<16x128xbf16, #tpu.memory_space<vmem>>, vector<16x128xbf16>
    tpu.vector_store %arg6[%c0_28, %c0_29], %73 {strides = array<i32>} : memref<16x128xbf16, #tpu.memory_space<vmem>>, vector<16x128xbf16>,
    return
  }
  func.func @transform_0(%arg0: i32) -> (i32, i32) {
    %c0_i32 = arith.constant 0 : i32
    %c0_i32_0 = arith.constant 0 : i32
    return %arg0, %c0_i32 : i32, i32
  }
  func.func @transform_1(%arg0: i32) -> (i32, i32) {
    %c0_i32 = arith.constant 0 : i32
    %c0_i32_0 = arith.constant 0 : i32
    %c0_i32_1 = arith.constant 0 : i32
    return %c0_i32, %c0_i32_0 : i32, i32
  }
  func.func @transform_2(%arg0: i32) -> (i32, i32) {
    %c0_i32 = arith.constant 0 : i32
    %c0_i32_0 = arith.constant 0 : i32
    %c0_i32_1 = arith.constant 0 : i32
    return %c0_i32, %c0_i32_0 : i32, i32
  }
  func.func @transform_3(%arg0: i32) -> (i32, i32) {
    %c0_i32 = arith.constant 0 : i32
    %c0_i32_0 = arith.constant 0 : i32
    %c0_i32_1 = arith.constant 0 : i32
    return %c0_i32, %c0_i32_0 : i32, i32
  }
  func.func @transform_4(%arg0: i32) -> (i32, i32) {
    %c0_i32 = arith.constant 0 : i32
    %c0_i32_0 = arith.constant 0 : i32
    %c0_i32_1 = arith.constant 0 : i32
    return %c0_i32, %c0_i32_0 : i32, i32
  }
  func.func @transform_5(%arg0: i32) -> (i32, i32) {
    %c0_i32 = arith.constant 0 : i32
    %c0_i32_0 = arith.constant 0 : i32
    return %arg0, %c0_i32 : i32, i32
  }
}

</mosaic_0001>

<bundles_post_ra>
// kernel: policy_forward.1
= control target key start
LH: loop header
LB: loop body
LE: loop exit
PB: predicated region body
PF: predicated region fallthrough
CT: control target
= control target key end

     0   :  { %10 = vsyncpa [#allocation3], 0  ;;  %s390_s18 = smov [#allocation2]   ;;  %s483_s0 = inlined_call_operand.vmem [shape: bf16[16,16], index: 0, kind: input, shape index: {}]   ;;  %s484_s1 = inlined_call_operand.vmem [shape: bf16[16,128], index: 1, kind: input, shape index: {}]   ;;  %s485_s2 = inlined_call_operand.vmem [shape: f32[1,128], index: 2, kind: input, shape index: {}]   ;;  %s486_s3 = inlined_call_operand.hbm [shape: bf16[128,128], index: 3, kind: input, shape index: {}]   ;;  %s487_s4 = inlined_call_operand.vmem [shape: f32[1,128], index: 4, kind: input, shape index: {}]   ;;  %s488_s5 = inlined_call_operand.vmem [shape: bf16[16,128], index: 5, kind: output, shape index: {}]  }
   0x1   :  { %s22_s19 = sshll.u32 %s390_s18, 4  ;;  %s366_s22 = scalar_lea.hbm %s486_s3, 1024  ;;  %s23_s19 = int_to_ptr.vmem [resolvable:$true] %s22_s19 }
   0x2   :  { %p367_p0 = scmp.ne.s32.totalorder %s486_s3, %s366_s22  ;;  %p370_p1 = scmp.lt.u32.totalorder %s366_s22, %s486_s3 }
   0x4   :  { %p372_p2 = pnand %p370_p1, %p367_p0 }
   0x6   :  { %375 = shalt.err (!%p372_p2)
}
   0x7   :  { %s376_s27 = scalar_lea.vmem %s23_s19, 1024  ;;  %p381_p4 = scmp.lt.s32.totalorder %s23_s19, %s23_s19 }
   0x8   :  { %p377_p3 = scmp.ne.s32.totalorder %s23_s19, %s376_s27  ;;  %p382_p5 = scmp.lt.s32.totalorder %s376_s27, %s376_s27 }
   0xa   :  { %p383_p6 = por %p382_p5, %p381_p4 }
   0xc   :  { %p384_p7 = pnand %p383_p6, %p377_p3 }
   0xe   :  { %387 = shalt.err (!%p384_p7)
}
   0xf   :  { %s391_s28 = smov 64   ;;  %s392_s29 = smov 4  }
  0x10   :  { %28 = dma.hbm_to_vmem [thread:$0]  %s486_s3, 1024, %s23_s19, [#allocation3], %s391_s28, %s391_s28, %s392_s29  }
  0x11   :  { %388 = dma.done.wait [#allocation3], 1024  }
  0x12   :  { %389 = vsyncadd [#allocation3], 4294966272  ;;  %v393_v0 = vmov 0.0   ;;  %vm394_vm0 = vmmov 0   ;;  %v348_v1 = vld [vmem:[%s484_s1] sm:$0xff]   ;;  %vm57_vm1 = vcmask 130048   ;;  %v217_v21 = vlaneseq }
  0x13   :  { %317 = vmatprep.subr.bf16.mxu0 %v393_v0  ;;  %319 = vmatprep.mubr.msk.bf16.mxu0 %vm394_vm0, %v393_v0  ;;  %v349_v2 = vld [vmem:[%s483_s0] sm:$0xff]   ;;  %v351_v4 = vld [vmem:[#allocation2 + $0x8] sm:$0xff]   ;;  %v352_v5 = vld [vmem:[#allocation2 + $0x10] sm:$0xff]  }
  0x14   :  { %323 = vmatprep.subr.bf16.mxu1 %v393_v0  ;;  %339 = vmatprep.mubr.msk.bf16.mxu1 %vm394_vm0, %v393_v0  ;;  %v350_v3 = vld [vmem:[#allocation2] sm:$0xff]   ;;  %v353_v6 = vld [vmem:[#allocation2 + $0x18] sm:$0xff]   ;;  %v355_v8 = vld [vmem:[#allocation2 + $0x28] sm:$0xff]   ;;  %v218_v22 = vand.u32 127, %v217_v21 }
  0x15   :  { %318 = vmatpush3.bf16.msra.mxu0 %v348_v1  ;;  %324 = vmatpush3.bf16.msra.mxu1 %v350_v3  ;;  %v354_v7 = vld [vmem:[#allocation2 + $0x20] sm:$0xff]   ;;  %v356_v9 = vld [vmem:[#allocation2 + $0x30] sm:$0xff]   ;;  %v357_v10 = vld [vmem:[#allocation2 + $0x38] sm:$0xff]  }
  0x16   :  { %325 = vmatprep.subr.bf16.mxu1 %v393_v0  ;;  %v284_v11 = vld [vmem:[%s485_s2] ss:$0 sm:$0xff]  ;;  %vm230_vm2 = vcmp.ge.s32.totalorder %v218_v22, 4  ;;  %vm231_vm3 = vcmp.lt.s32.totalorder %v218_v22, 10  ;;  %vm220_vm5 = vcmp.lt.s32.totalorder %v218_v22, 4 }
  0x17   :  { %v288_v23 = vld [vmem:[%s487_s4] ss:$0 sm:$0xff]  ;;  %vm450_vm4 = vmand %vm230_vm2, %vm231_vm3 }
  0x18   :  { %320 = vmatmul.mubr.msk.bf16.vlgmr.msra.gmra.mrb[0].mxu0 %vm57_vm1, %v349_v2 }
  0x19   :  { %326 = vmatpush3.bf16.msra.mxu1 %v351_v4 }
  0x1a   :  { %327 = vmatprep.subr.bf16.mxu1 %v393_v0 }
  0x1d   :  { %328 = vmatpush3.bf16.msra.mxu1 %v352_v5 }
  0x1e   :  { %329 = vmatprep.subr.bf16.mxu1 %v393_v0 }
  0x21   :  { %330 = vmatpush3.bf16.msra.mxu1 %v353_v6 }
  0x22   :  { %331 = vmatprep.subr.bf16.mxu1 %v393_v0 }
  0x25   :  { %332 = vmatpush3.bf16.msra.mxu1 %v354_v7 }
  0x26   :  { %333 = vmatprep.subr.bf16.mxu1 %v393_v0 }
  0x29   :  { %334 = vmatpush3.bf16.msra.mxu1 %v355_v8 }
  0x2a   :  { %335 = vmatprep.subr.bf16.mxu1 %v393_v0 }
  0x2d   :  { %336 = vmatpush3.bf16.msra.mxu1 %v356_v9 }
  0x2e   :  { %337 = vmatprep.subr.bf16.mxu1 %v393_v0 }
  0x31   :  { %338 = vmatpush3.bf16.msra.mxu1 %v357_v10 }
  0xeb   :  { %v95_v12 = vpop.f32.mrb[0].mxu0 }
  0xec   :  { %v96_v13 = vadd.f32 %v284_v11, %v95_v12  ;;  %v321_v14 = vpop.f32.mrb[1].mxu0 }
  0xed   :  { %v98_v15 = vpop.f32.mrb[2].mxu0 }
  0xee   :  { %v99_v16 = vadd.f32 %v284_v11, %v98_v15  ;;  %v322_v17 = vpop.f32.mrb[3].mxu0  ;;  %v102_v18 = vmax.f32 %v96_v13, 0.0 }
  0xf0   :  { %v103_v19 = vmax.f32 %v99_v16, 0.0 }
  0xf2   :  { %v104_v20 = vpack.c.bf16 %v103_v19, %v102_v18 }
  0xf4   :  { %340 = vmatmul.mubr.bf16.vlgmr.msra.gmra.mrb[0].mxu1 %v104_v20 }
 0x1c7   :  { %v210_v24 = vpop.f32.mrb[0].mxu1 }
 0x1c8   :  { %v211_v26 = vadd.f32 %v288_v23, %v210_v24  ;;  %v341_v27 = vpop.f32.mrb[1].mxu1 }
 0x1c9   :  { %v213_v28 = vpop.f32.mrb[2].mxu1 }
 0x1ca   :  { %v214_v29 = vadd.f32 %v288_v23, %v213_v28  ;;  %v342_v30 = vpop.f32.mrb[3].mxu1  ;;  %v233_v31 = vsel %vm450_vm4, %v211_v26, -inf  ;;  %v222_v32 = vsel %vm220_vm5, %v211_v26, -inf }
 0x1cb   :  { %235 = vmax.xlane.f32.xlu1 %v233_v31  ;;  %224 = vmax.xlane.f32.xlu0 %v222_v32 }
 0x1cc   :  { %v234_v33 = vsel %vm450_vm4, %v214_v29, -inf  ;;  %v223_v34 = vsel %vm220_vm5, %v214_v29, -inf }
 0x1cf   :  { %237 = vmax.xlane.f32.xlu1 %v234_v33  ;;  %226 = vmax.xlane.f32.xlu0 %v223_v34 }
 0x258   :  { %v236_v35 = vpop.xlane.xlu1 %235  ;;  %v225_v36 = vpop.xlane.xlu0 %224 }
 0x259   :  { %v228_v37 = vsel %vm220_vm5, %v225_v36, 0.0 }
 0x25a   :  { %v239_v38 = vsel %vm450_vm4, %v236_v35, %v228_v37 }
 0x25b   :  { %v241_v39 = vsub.f32 %v211_v26, %v239_v38 }
 0x25c   :  { %v238_v40 = vpop.xlane.xlu1 %237  ;;  %v227_v41 = vpop.xlane.xlu0 %226 }
 0x25d   :  { %v243_v42 = vsel %vm231_vm3, %v241_v39, -inf  ;;  %v229_v43 = vsel %vm220_vm5, %v227_v41, 0.0 }
 0x25e   :  { %v245_v44 = vmul.f32 1.442695, %v243_v42  ;;  %v240_v45 = vsel %vm450_vm4, %v238_v40, %v229_v43 }
 0x25f   :  { %v242_v46 = vsub.f32 %v214_v29, %v240_v45 }
 0x260   :  { %358 = vpow2.f32 %v245_v44 }
 0x261   :  { %v244_v47 = vsel %vm231_vm3, %v242_v46, -inf }
 0x262   :  { %v247_v48 = vmul.f32 1.442695, %v244_v47 }
 0x264   :  { %360 = vpow2.f32 %v247_v48 }
 0x26a   :  { %v359_v49 = vpop.eup %358 }
 0x26b   :  { %v249_v50 = vsel %vm220_vm5, %v359_v49, 0.0  ;;  %v257_v52 = vsel %vm450_vm4, %v359_v49, 0.0 }
 0x26c   :  { %251 = vadd.xlane.f32.xlu0 %v249_v50 }
 0x26e   :  { %v361_v51 = vpop.eup %360 }
 0x26f   :  { %v250_v53 = vsel %vm220_vm5, %v361_v51, 0.0  ;;  %v258_v54 = vsel %vm450_vm4, %v361_v51, 0.0 }
 0x270   :  { %259 = vadd.xlane.f32.xlu0 %v257_v52  ;;  %253 = vadd.xlane.f32.xlu1 %v250_v53 }
 0x274   :  { %261 = vadd.xlane.f32.xlu1 %v258_v54 }
 0x2f9   :  { %v252_v55 = vpop.xlane.xlu0 %251 }
 0x2fa   :  { %v255_v56 = vsel %vm220_vm5, %v252_v55, 1.0 }
 0x2fd   :  { %v254_v57 = vpop.xlane.xlu1 %253  ;;  %v260_v58 = vpop.xlane.xlu0 %259 }
 0x2fe   :  { %v263_v59 = vsel %vm450_vm4, %v260_v58, %v255_v56  ;;  %v256_v60 = vsel %vm220_vm5, %v254_v57, 1.0 }
 0x2ff   :  { %362 = vrcp.f32 %v263_v59 }
 0x301   :  { %v262_v61 = vpop.xlane.xlu1 %261 }
 0x302   :  { %v264_v62 = vsel %vm450_vm4, %v262_v61, %v256_v60 }
 0x303   :  { %364 = vrcp.f32 %v264_v62 }
 0x309   :  { %v363_v63 = vpop.eup %362 }
 0x30a   :  { %v267_v1 = vmul.f32 %v363_v63, %v359_v49 }
 0x30d   :  { %v365_v0 = vpop.eup %364 }
 0x30e   :  { %v268_v2 = vmul.f32 %v365_v0, %v361_v51 }
 0x310   :  { %v304_v3 = vpack.c.bf16 %v268_v2, %v267_v1 }
 0x312   :  { %305 = vst [vmem:[%s488_s5] sm:$0xff] %v304_v3  }
 0x313   :  { %283 = vsyncpa [#allocation3], 1 }

</bundles_post_ra>
